<compile_context>
chip_gen: v5e
topology: v5e:2x2
jax: 0.10.0
libtpu: 0.0.40
codegen_flags: <defaults>
</compile_context>

<pallas_src>
import jax
import jax.numpy as jnp
from jax.experimental import pallas as pl
from jax.experimental.pallas import tpu as pltpu


def _round_up(n, m):
    return ((n + m - 1) // m) * m


def _linear_relu_kernel(x_ref, w_ref, b_ref, o_ref):
    # MXU matmul on bf16 operands with f32 accumulation; bias + ReLU on the VPU in f32.
    acc = jnp.dot(x_ref[...], w_ref[...], preferred_element_type=jnp.float32)
    acc = acc + b_ref[...]                       # (TM, D_out) + (1, D_out) broadcast
    o_ref[...] = jnp.maximum(acc, 0.0).astype(o_ref.dtype)


def backbone_dnnfm_forward(x, w_t, b, *, tm=512):
    """x: (B, D_in) f32, w_t: (D_in, D_out) f32, b: (D_out,) or (1, D_out) f32 -> (B, D_out) f32."""
    B, D_in = x.shape
    D_out = w_t.shape[1]

    # bf16 matmul operands (native MXU input dtype); f32 bias / accumulator / output.
    xb = x.astype(jnp.bfloat16)
    wb = w_t.astype(jnp.bfloat16)
    bf = b.astype(jnp.float32).reshape(1, D_out)

    # Batch tile: multiple of 16 (bf16 sublane packing); pad batch up to a tile multiple.
    tm = min(tm, _round_up(B, 16))
    b_pad = _round_up(B, tm)
    if b_pad != B:
        xb = jnp.pad(xb, ((0, b_pad - B), (0, 0)))
    grid = (b_pad // tm,)

    flops = 2 * b_pad * D_in * D_out
    bytes_accessed = xb.size * 2 + wb.size * 2 + bf.size * 4 + b_pad * D_out * 4

    out = pl.pallas_call(
        _linear_relu_kernel,
        out_shape=jax.ShapeDtypeStruct((b_pad, D_out), jnp.float32),
        grid_spec=pltpu.PrefetchScalarGridSpec(
            num_scalar_prefetch=0,
            grid=grid,
            in_specs=[
                pl.BlockSpec((tm, D_in), lambda i: (i, 0)),       # streamed per batch tile
                pl.BlockSpec((D_in, D_out), lambda i: (0, 0)),    # weight: VMEM-resident
                pl.BlockSpec((1, D_out), lambda i: (0, 0)),       # bias:   VMEM-resident
            ],
            out_specs=pl.BlockSpec((tm, D_out), lambda i: (i, 0)),
        ),
        compiler_params=pltpu.CompilerParams(
            dimension_semantics=("parallel",),                    # lets v7x use both TCs
        ),
        cost_estimate=pl.CostEstimate(
            flops=flops, transcendentals=0, bytes_accessed=bytes_accessed),
    )(xb, wb, bf)

    return out[:B] if b_pad != B else out


def reference_forward(x, w_t, b):
    return jnp.maximum(x @ w_t + b.reshape(1, -1), 0.0)


if __name__ == "__main__":
    hidden_dims = [256, 128]   # matches module default: Linear(256, 128)
    B = 8                      # small batch

    key = jax.random.PRNGKey(0)
    kx, kw, kb = jax.random.split(key, 3)

    x = jax.random.normal(kx, (B, hidden_dims[0]), dtype=jnp.float32)
    # PyTorch Linear weight is (out, in); store transposed so the kernel does x @ W^T + b.
    bound = 1.0 / (hidden_dims[0] ** 0.5)
    w_pt = jax.random.uniform(kw, (hidden_dims[1], hidden_dims[0]),
                              dtype=jnp.float32, minval=-bound, maxval=bound)
    b_pt = jax.random.uniform(kb, (hidden_dims[1],),
                              dtype=jnp.float32, minval=-bound, maxval=bound)
    w_t = w_pt.T                              # (D_in, D_out)

    out = backbone_dnnfm_forward(x, w_t, b_pt)
    out = jax.block_until_ready(out)

    ref = reference_forward(x, w_t, b_pt)
    assert out.shape == (B, hidden_dims[1])
    # bf16 matmul operands -> compare against the f32 reference with a bf16-appropriate tolerance.
    assert jnp.allclose(out, ref, atol=2e-2, rtol=2e-2), float(jnp.max(jnp.abs(out - ref)))

    # Dropout with p=0.0 is identity (train & eval), so nothing to emit for it.
    print("KERNEL_OK")
</pallas_src>

<mosaic_0001>
module attributes {stable_mosaic.version = 11 : i64} {
  func.func @_linear_relu_kernel(%arg0: i32, %arg1: memref<16x256xbf16, #tpu.memory_space<vmem>>, %arg2: memref<256x128xbf16, #tpu.memory_space<vmem>>, %arg3: memref<1x128xf32, #tpu.memory_space<vmem>>, %arg4: memref<16x128xf32, #tpu.memory_space<vmem>>) attributes {dimension_semantics = [#tpu.dimension_semantics<parallel>], iteration_bounds = array<i64: 1>, scalar_prefetch = 0 : i64, scratch_operands = 0 : i64, tpu.core_type = #tpu.core_type<tc>, window_params = [{transform_indices = @transform_0, window_bounds = array<i64: 16, 256>}, {pipeline_mode = #tpu.pipeline_mode<synchronous>, transform_indices = @transform_1, window_bounds = array<i64: 256, 128>}, {pipeline_mode = #tpu.pipeline_mode<synchronous>, transform_indices = @transform_2, window_bounds = array<i64: 1, 128>}, {transform_indices = @transform_3, window_bounds = array<i64: 16, 128>}]} {
    %c0 = arith.constant 0 : index
    %c0_0 = arith.constant 0 : index
    %0 = vector.load %arg1[%c0, %c0_0] : memref<16x256xbf16, #tpu.memory_space<vmem>>, vector<16x256xbf16>
    %c0_1 = arith.constant 0 : index
    %c0_2 = arith.constant 0 : index
    %1 = vector.load %arg2[%c0_1, %c0_2] : memref<256x128xbf16, #tpu.memory_space<vmem>>, vector<256x128xbf16>
    %cst = arith.constant dense<0.000000e+00> : vector<16x128xf32>
    %2 = tpu.matmul %0, %1, %cst {dimension_numbers = #tpu.dot_dimension_numbers<[1], [0], [0], [1], [0, 0, 1, 1], [], []>} : vector<16x256xbf16>, vector<256x128xbf16>, vector<16x128xf32> -> vector<16x128xf32>
    %c0_3 = arith.constant 0 : index
    %c0_4 = arith.constant 0 : index
    %3 = vector.load %arg3[%c0_3, %c0_4] : memref<1x128xf32, #tpu.memory_space<vmem>>, vector<1x128xf32>
    %4 = vector.broadcast %3 : vector<1x128xf32> to vector<16x128xf32>
    %5 = arith.addf %2, %4 : vector<16x128xf32>
    %cst_5 = arith.constant 0.000000e+00 : f32
    %6 = vector.broadcast %cst_5 : f32 to vector<16x128xf32>
    %7 = arith.maximumf %5, %6 : vector<16x128xf32>
    %c0_6 = arith.constant 0 : index
    %c0_7 = arith.constant 0 : index
    %8 = vector.load %arg4[%c0_6, %c0_7] : memref<16x128xf32, #tpu.memory_space<vmem>>, vector<16x128xf32>
    tpu.vector_store %arg4[%c0_6, %c0_7], %7 {strides = array<i32>} : memref<16x128xf32, #tpu.memory_space<vmem>>, vector<16x128xf32>,
    return
  }
  func.func @transform_0(%arg0: i32) -> (i32, i32) {
    %c0_i32 = arith.constant 0 : i32
    %c0_i32_0 = arith.constant 0 : i32
    return %arg0, %c0_i32 : i32, i32
  }
  func.func @transform_1(%arg0: i32) -> (i32, i32) {
    %c0_i32 = arith.constant 0 : i32
    %c0_i32_0 = arith.constant 0 : i32
    %c0_i32_1 = arith.constant 0 : i32
    return %c0_i32, %c0_i32_0 : i32, i32
  }
  func.func @transform_2(%arg0: i32) -> (i32, i32) {
    %c0_i32 = arith.constant 0 : i32
    %c0_i32_0 = arith.constant 0 : i32
    %c0_i32_1 = arith.constant 0 : i32
    return %c0_i32, %c0_i32_0 : i32, i32
  }
  func.func @transform_3(%arg0: i32) -> (i32, i32) {
    %c0_i32 = arith.constant 0 : i32
    %c0_i32_0 = arith.constant 0 : i32
    return %arg0, %c0_i32 : i32, i32
  }
}

</mosaic_0001>

<bundles_post_ra>
// kernel: tpu_custom_call.1
= control target key start
LH: loop header
LB: loop body
LE: loop exit
PB: predicated region body
PF: predicated region fallthrough
CT: control target
= control target key end

     0   :  { %8 = vsyncpa [#allocation3], 0  ;;  %s464_s0 = inlined_call_operand.hbm [shape: bf16[16,256], index: 0, kind: input, shape index: {}]   ;;  %s465_s1 = inlined_call_operand.hbm [shape: bf16[256,128], index: 1, kind: input, shape index: {}]   ;;  %s466_s2 = inlined_call_operand.vmem [shape: f32[1,128], index: 2, kind: input, shape index: {}]   ;;  %s467_s3 = inlined_call_operand.hbm [shape: f32[16,128], index: 3, kind: output, shape index: {}]  }
   0x1   :  { %9 = vsyncpa [#allocation6], 0 }
   0x2   :  { %10 = vsyncpa [#allocation4], 0  ;;  %s15_s14 = sshll.u32 %s464_s0, 4  ;;  %s419_s15 = smov [#allocation2]   ;;  %s16_s14 = int_to_ptr.hbm [resolvable:$true] %s15_s14 }
   0x3   :  { %s17_s16 = sshll.u32 %s419_s15, 4  ;;  %s28_s19 = sshll.u32 %s465_s1, 4  ;;  %s18_s16 = int_to_ptr.vmem [resolvable:$true] %s17_s16  ;;  %s29_s19 = int_to_ptr.hbm [resolvable:$true] %s28_s19 }
   0x4   :  { %s420_s20 = smov 128   ;;  %s421_s21 = smov 8  }
   0x5   :  { %23 = dma.hbm_to_vmem [thread:$0]  %s16_s14, 256, %s18_s16, [#allocation3], %s420_s20, %s420_s20, %s421_s21  }
   0x6   :  { %s422_s22 = smov [#allocation5]   ;;  %s423_s24 = smov 64  }
   0x7   :  { %s30_s23 = sshll.u32 %s422_s22, 4  ;;  %s424_s0 = smov 4   ;;  %s31_s23 = int_to_ptr.vmem [resolvable:$true] %s30_s23 }
   0x8   :  { %36 = dma.hbm_to_vmem [thread:$0]  %s29_s19, 2048, %s31_s23, [#allocation6], %s423_s24, %s423_s24, %s424_s0  }
   0x9   :  { %413 = dma.done.wait [#allocation3], 256  }
   0xa   :  { %414 = vsyncadd [#allocation3], 4294967040 }
   0xb   :  { %415 = dma.done.wait [#allocation6], 2048  }
   0xc   :  { %416 = vsyncadd [#allocation6], 4294965248  ;;  %v324_v0 = vld [vmem:[#allocation5 + $0x38] sm:$0xff]  ;;  %v323_v2 = vld [vmem:[#allocation5 + $0x30] sm:$0xff]  ;;  %s425_s26 = smov [#allocation7]   ;;  %s229_s30 = sshll.u32 %s467_s3, 4  ;;  %s230_s30 = int_to_ptr.hbm [resolvable:$true] %s229_s30 }
   0xd   :  { %v332_v1 = vld [vmem:[#allocation5 + $0x78] sm:$0xff]  ;;  %191 = vmatpush.bf16.msra.mxu0 %v324_v0  ;;  %v331_v3 = vld [vmem:[#allocation5 + $0x70] sm:$0xff]  ;;  %v322_v4 = vld [vmem:[#allocation5 + $0x28] sm:$0xff]  ;;  %s227_s27 = sshll.u32 %s425_s26, 4  ;;  %s228_s27 = int_to_ptr.vmem [resolvable:$true] %s227_s27 }
   0xe   :  { %205 = vmatpush.bf16.msra.mxu1 %v332_v1  ;;  %v330_v5 = vld [vmem:[#allocation5 + $0x68] sm:$0xff]  ;;  %v321_v6 = vld [vmem:[#allocation5 + $0x20] sm:$0xff]  ;;  %v320_v8 = vld [vmem:[#allocation5 + $0x18] sm:$0xff] }
   0xf   :  { %v329_v7 = vld [vmem:[#allocation5 + $0x60] sm:$0xff]  ;;  %v328_v9 = vld [vmem:[#allocation5 + $0x58] sm:$0xff]  ;;  %v319_v10 = vld [vmem:[#allocation5 + $0x10] sm:$0xff] }
  0x10   :  { %v327_v11 = vld [vmem:[#allocation5 + $0x50] sm:$0xff]  ;;  %v318_v12 = vld [vmem:[#allocation5 + $0x8] sm:$0xff]  ;;  %v317_v14 = vld [vmem:[#allocation5] sm:$0xff] }
  0x11   :  { %192 = vmatpush.bf16.msra.mxu0 %v323_v2  ;;  %v326_v13 = vld [vmem:[#allocation5 + $0x48] sm:$0xff]  ;;  %v325_v15 = vld [vmem:[#allocation5 + $0x40] sm:$0xff]  ;;  %v245_v16 = vld [vmem:[#allocation2] sm:$0xf] }
  0x12   :  { %206 = vmatpush.bf16.msra.mxu1 %v331_v3  ;;  %v316_v17 = vld [vmem:[#allocation2 + $0x4] sm:$0xf0]  ;;  %v315_v18 = vld [vmem:[#allocation2 + $0x4] sm:$0xf]  ;;  %v247_v19 = vld [vmem:[#allocation2 + $0x8] sm:$0xf0] }
  0x13   :  { %v246_v20 = vor.u32 %v316_v17, %v245_v16  ;;  %v250_v21 = vor.u32 %v315_v18, %v247_v19  ;;  %v340_v22 = vld [vmem:[%s466_s2] ss:$0 sm:$0xff] }
  0x15   :  { %193 = vmatpush.bf16.msra.mxu0 %v322_v4 }
  0x16   :  { %207 = vmatpush.bf16.msra.mxu1 %v330_v5 }
  0x19   :  { %194 = vmatpush.bf16.msra.mxu0 %v321_v6 }
  0x1a   :  { %208 = vmatpush.bf16.msra.mxu1 %v329_v7 }
  0x1d   :  { %195 = vmatpush.bf16.msra.mxu0 %v320_v8 }
  0x1e   :  { %209 = vmatpush.bf16.msra.mxu1 %v328_v9 }
  0x21   :  { %196 = vmatpush.bf16.msra.mxu0 %v319_v10 }
  0x22   :  { %210 = vmatpush.bf16.msra.mxu1 %v327_v11 }
  0x25   :  { %197 = vmatpush.bf16.msra.mxu0 %v318_v12 }
  0x26   :  { %211 = vmatpush.bf16.msra.mxu1 %v326_v13 }
  0x29   :  { %198 = vmatpush.bf16.msra.mxu0 %v317_v14 }
  0x2a   :  { %212 = vmatpush.bf16.msra.mxu1 %v325_v15 }
  0x2c   :  { %199 = vmatmul.bf16.vlgmr.msra.gmra.mxu0 %v246_v20 }
  0x2d   :  { %213 = vmatmul.bf16.vlgmr.msra.gmra.mxu1 %v250_v21 }
  0xa9   :  { %v200_v23 = vpop.f32.mrf.mxu0 }
  0xaa   :  { %v214_v24 = vpop.f32.mrf.mxu1  ;;  %v201_v25 = vadd.f32 %v340_v22, %v200_v23 }
  0xac   :  { %v215_v26 = vadd.f32 %v214_v24, %v201_v25 }
  0xae   :  { %v219_v27 = vmax.f32 %v215_v26, 0.0 }
  0xb0   :  { %221 = vst [vmem:[#allocation7] sm:$0xff] %v219_v27 }
  0xb1   :  { %v202_v28 = vpop.f32.mrf.mxu0 }
  0xb2   :  { %v203_v29 = vadd.f32 %v340_v22, %v202_v28  ;;  %v216_v30 = vpop.f32.mrf.mxu1 }
  0xb4   :  { %v217_v31 = vadd.f32 %v216_v30, %v203_v29 }
  0xb6   :  { %v220_v32 = vmax.f32 %v217_v31, 0.0 }
  0xb8   :  { %222 = vst [vmem:[#allocation7 + $0x8] sm:$0xff] %v220_v32 }
  0xb9   :  { %235 = dma.vmem_to_hbm [thread:$0]  %s228_s27, 256, %s230_s30, [#allocation4], %s420_s20, %s420_s20, %s421_s21  }
  0xba   :  { %417 = dma.done.wait [#allocation4], 256  }
  0xbb   :  { %418 = vsyncadd [#allocation4], 4294967040 }
  0xbc   :  { %240 = vsyncpa [#allocation3], 1 }
  0xbd   :  { %241 = vsyncpa [#allocation6], 1 }
  0xbe   :  { %242 = vsyncpa [#allocation4], 1 }

</bundles_post_ra>
